<compile_context>
chip_gen: v7x
topology: tpu7x:2x2x1
jax: 0.10.0
libtpu: 0.0.40
codegen_flags: <defaults>
</compile_context>

<pallas_src>
import functools
import math

import jax
import jax.numpy as jnp
from jax.experimental import pallas as pl
from jax.experimental.pallas import tpu as pltpu

LEAKY_SLOPE = 0.01  # nn.LeakyReLU default negative slope
LANE = 128          # vreg lane width


def _round_up(n, m):
    return ((n + m - 1) // m) * m


def _sublane_rows(dtype):
    # Rows per packed vreg sublane tile: 8 (f32), 16 (bf16), 32 (int8/fp8).
    return max(8, 32 // jnp.dtype(dtype).itemsize)


def _vmem_capacity_bytes():
    try:
        return int(pltpu.get_tpu_info().vmem_capacity_bytes)
    except Exception:
        return 64 << 20  # conservative (v7x per-TensorCore)


def _probe_single_buffered_weights():
    """Return 1 if pipeline_mode=pl.Buffered(1) lowers/runs here, else 2."""
    if not hasattr(pl, "Buffered"):
        return 2

    def k(a_ref, w_ref, o_ref):
        o_ref[...] = a_ref[...] + w_ref[...]

    try:
        f = pl.pallas_call(
            k,
            out_shape=jax.ShapeDtypeStruct((16, 128), jnp.float32),
            grid=(2,),
            in_specs=[
                pl.BlockSpec((8, 128), lambda i: (i, 0)),
                pl.BlockSpec((8, 128), lambda i: (0, 0),
                             pipeline_mode=pl.Buffered(1)),
            ],
            out_specs=pl.BlockSpec((8, 128), lambda i: (i, 0)),
        )
        jax.block_until_ready(
            f(jnp.zeros((16, 128), jnp.float32),
              jnp.zeros((8, 128), jnp.float32)))
        return 1
    except Exception:
        return 2


def _fcnet_kernel(num_layers, x_ref, *refs):
    # refs = (w0, b0, w1, b1, ..., w_out, b_out, out_ref)
    out_ref = refs[-1]
    param_refs = refs[:-1]

    h = x_ref[...]
    # Hidden StandardFC layers: Linear + LeakyReLU (dropout = identity in eval).
    for i in range(num_layers):
        w = param_refs[2 * i][...]
        b = param_refs[2 * i + 1][...]
        z = jnp.dot(h, w, preferred_element_type=jnp.float32) + b
        z = jnp.maximum(z, LEAKY_SLOPE * z)     # leaky-relu: one VALU max
        h = z.astype(x_ref.dtype)               # keep MXU inputs in caller dtype
    # Final output Linear (no activation).
    w = param_refs[-2][...]
    b = param_refs[-1][...]
    y = jnp.dot(h, w, preferred_element_type=jnp.float32) + b
    out_ref[...] = y.astype(out_ref.dtype)


def prepare_params(params, dtype=jnp.float32):
    """One-time (outside the jitted forward) pad + cast of the weight set.

    params: flat list [w0, b0, ..., w_out, b_out], weights stored transposed,
    i.e. (in_features, out_features) == PyTorch W.T. Returns the lane-padded,
    dtype-cast list that fcnet_forward consumes directly.
    """
    num_layers = len(params) // 2 - 1
    dims = [params[0].shape[0]] + [params[2 * i].shape[1]
                                   for i in range(num_layers + 1)]
    pdims = [_round_up(d, LANE) for d in dims]
    padded = []
    for i in range(num_layers + 1):
        w, b = params[2 * i], params[2 * i + 1]
        wp = jnp.pad(w, ((0, pdims[i] - w.shape[0]),
                         (0, pdims[i + 1] - w.shape[1])))
        bp = jnp.pad(b, ((0, 0), (0, pdims[i + 1] - b.shape[1])))
        padded += [wp.astype(dtype), bp.astype(dtype)]
    return padded


@functools.partial(jax.jit, static_argnames=("out_ch", "tile_b", "weight_buffers"))
def fcnet_forward(x, padded_params, *, out_ch, tile_b=256, weight_buffers=2):
    """x: (B, in_ch); padded_params: output of prepare_params (already padded)."""
    num_layers = len(padded_params) // 2 - 1
    B, in_ch = x.shape
    pdims = [padded_params[0].shape[0]] + [padded_params[2 * i].shape[1]
                                           for i in range(num_layers + 1)]
    assert in_ch <= pdims[0], "input feature dim exceeds padded weight dim"

    # ---- pad batch; round to the dtype's sublane packing (8 f32 / 16 bf16) ----
    sub = _sublane_rows(x.dtype)
    if B <= tile_b:
        tb = _round_up(B, sub)
        Bp = tb
    else:
        tb = tile_b
        Bp = _round_up(B, tb)
    xp = jnp.pad(x, ((0, Bp - B), (0, pdims[0] - in_ch)))

    grid = (Bp // tb,)

    # x / out tiles stream over the batch grid (2-deep pipeline); weights stay
    # VMEM-resident with constant index maps and (if supported) single buffers.
    use_single = weight_buffers == 1 and hasattr(pl, "Buffered")
    in_specs = [pl.BlockSpec((tb, pdims[0]), lambda i: (i, 0))]
    for p in padded_params:
        if use_single:
            spec = pl.BlockSpec(p.shape, lambda i: (0, 0),
                                pipeline_mode=pl.Buffered(1))
        else:
            spec = pl.BlockSpec(p.shape, lambda i: (0, 0))
        in_specs.append(spec)
    out_spec = pl.BlockSpec((tb, pdims[-1]), lambda i: (i, 0))

    # ---- generation-aware VMEM budget --------------------------------------
    itemsize = jnp.dtype(x.dtype).itemsize
    wbuf = 1 if use_single else 2
    param_bytes = sum(int(math.prod(p.shape)) * p.dtype.itemsize
                      for p in padded_params)
    # streamed x / out tiles, double-buffered by the pipeline
    stream_bytes = 2 * tb * (pdims[0] + pdims[-1]) * itemsize
    # widest per-layer f32 intermediates (z and next-h) -> compiler scratch
    interm_bytes = max(tb * (pdims[i] + pdims[i + 1]) * 4
                       for i in range(num_layers + 1))
    vmem_needed = wbuf * param_bytes + stream_bytes + interm_bytes + (2 << 20)

    vmem_cap = _vmem_capacity_bytes()          # 128 MiB v5e/v6e, 64 MiB v7x TC
    budget = vmem_cap - (4 << 20)              # headroom for compiler internals
    # TODO(synk): weight sets larger than `budget` should stream weights per
    # layer with manual double-buffered DMA instead of resident blocks.
    assert vmem_needed <= budget, (
        f"resident weights + activations ({vmem_needed >> 20} MiB) exceed this "
        f"generation's VMEM budget ({budget >> 20} MiB); stream weights per "
        f"layer (P4) or shrink tile_b")
    vmem_limit = int(min(max(vmem_needed, 32 << 20), budget))

    flops = 2 * Bp * sum(pdims[i] * pdims[i + 1] for i in range(num_layers + 1))
    bytes_accessed = param_bytes + (Bp * pdims[0] + Bp * pdims[-1]) * itemsize
    cost = pl.CostEstimate(flops=flops, transcendentals=0,
                           bytes_accessed=bytes_accessed)

    kernel = functools.partial(_fcnet_kernel, num_layers)
    yp = pl.pallas_call(
        kernel,
        out_shape=jax.ShapeDtypeStruct((Bp, pdims[-1]), x.dtype),
        grid=grid,
        in_specs=in_specs,
        out_specs=out_spec,
        compiler_params=pltpu.CompilerParams(
            dimension_semantics=("parallel",),
            vmem_limit_bytes=vmem_limit),
        cost_estimate=cost,
    )(xp, *padded_params)

    return yp[:B, :out_ch]


def make_params(key, in_ch, out_ch, num_layers):
    """Deterministic init mirroring FCNet.__init__ layer shapes.

    Hidden layer i: Linear(in_ch * 2**i, in_ch * 2**(i+1))
    Output layer:   Linear(in_ch * 2**num_layers, out_ch)
    Weights stored as (in_features, out_features) == PyTorch W.T.
    """
    params = []
    dims = [in_ch * 2 ** i for i in range(num_layers + 1)] + [out_ch]
    for i in range(num_layers + 1):
        fan_in, fan_out = dims[i], dims[i + 1]
        key, kw, kb = jax.random.split(key, 3)
        bound = 1.0 / jnp.sqrt(jnp.float32(fan_in))
        w = jax.random.uniform(kw, (fan_in, fan_out), jnp.float32, -bound, bound)
        b = jax.random.uniform(kb, (1, fan_out), jnp.float32, -bound, bound)
        params += [w, b]
    return params


def fcnet_reference(x, params):
    """Pure-JAX reference for correctness checking."""
    num_layers = len(params) // 2 - 1
    h = x
    for i in range(num_layers):
        h = h @ params[2 * i] + params[2 * i + 1]
        h = jnp.where(h >= 0, h, LEAKY_SLOPE * h)
    return h @ params[-2] + params[-1]


if __name__ == "__main__":
    in_ch, out_ch, num_layers = 8, 4, 3
    batch = 4

    key = jax.random.PRNGKey(0)
    key, kx = jax.random.split(key)
    x = jax.random.normal(kx, (batch, in_ch), jnp.float32)  # FCNet requires 2-D input

    params = make_params(key, in_ch, out_ch, num_layers)
    y_ref = fcnet_reference(x, params)

    # Decide weight buffering once (single-buffered resident weights if supported).
    weight_buffers = _probe_single_buffered_weights()

    # f32 path: exact vs reference.
    padded_f32 = prepare_params(params, jnp.float32)
    y = fcnet_forward(x, padded_f32, out_ch=out_ch, weight_buffers=weight_buffers)
    y = jax.block_until_ready(y)
    assert y.shape == (batch, out_ch)
    assert jnp.allclose(y, y_ref, atol=1e-4, rtol=1e-4), "f32 mismatch vs reference"

    # bf16 fast path: bf16 weights/activations, f32 MXU accumulation.
    padded_bf16 = prepare_params(params, jnp.bfloat16)
    y16 = fcnet_forward(x.astype(jnp.bfloat16), padded_bf16, out_ch=out_ch,
                        weight_buffers=weight_buffers)
    y16 = jax.block_until_ready(y16).astype(jnp.float32)
    assert jnp.allclose(y16, y_ref, atol=1e-1, rtol=1e-1), "bf16 mismatch vs reference"

    print("KERNEL_OK")
</pallas_src>

<mosaic_0001>
module attributes {stable_mosaic.version = 11 : i64} {
  func.func @k(%arg0: i32, %arg1: memref<8x128xf32, #tpu.memory_space<vmem>>, %arg2: memref<8x128xf32, #tpu.memory_space<vmem>>, %arg3: memref<8x128xf32, #tpu.memory_space<vmem>>) attributes {dimension_semantics = [#tpu.dimension_semantics<arbitrary>], iteration_bounds = array<i64: 2>, scalar_prefetch = 0 : i64, scratch_operands = 0 : i64, tpu.core_type = #tpu.core_type<tc>, window_params = [{transform_indices = @transform_0, window_bounds = array<i64: 8, 128>}, {pipeline_mode = #tpu.pipeline_mode<synchronous>, transform_indices = @transform_1, window_bounds = array<i64: 8, 128>}, {transform_indices = @transform_2, window_bounds = array<i64: 8, 128>}]} {
    %c0 = arith.constant 0 : index
    %c0_0 = arith.constant 0 : index
    %0 = vector.load %arg1[%c0, %c0_0] : memref<8x128xf32, #tpu.memory_space<vmem>>, vector<8x128xf32>
    %c0_1 = arith.constant 0 : index
    %c0_2 = arith.constant 0 : index
    %1 = vector.load %arg2[%c0_1, %c0_2] : memref<8x128xf32, #tpu.memory_space<vmem>>, vector<8x128xf32>
    %2 = arith.addf %0, %1 : vector<8x128xf32>
    %c0_3 = arith.constant 0 : index
    %c0_4 = arith.constant 0 : index
    %3 = vector.load %arg3[%c0_3, %c0_4] : memref<8x128xf32, #tpu.memory_space<vmem>>, vector<8x128xf32>
    tpu.vector_store %arg3[%c0_3, %c0_4], %2 {strides = array<i32>} : memref<8x128xf32, #tpu.memory_space<vmem>>, vector<8x128xf32>,
    return
  }
  func.func @transform_0(%arg0: i32) -> (i32, i32) {
    %c0_i32 = arith.constant 0 : i32
    %c0_i32_0 = arith.constant 0 : i32
    return %arg0, %c0_i32 : i32, i32
  }
  func.func @transform_1(%arg0: i32) -> (i32, i32) {
    %c0_i32 = arith.constant 0 : i32
    %c0_i32_0 = arith.constant 0 : i32
    %c0_i32_1 = arith.constant 0 : i32
    return %c0_i32, %c0_i32_0 : i32, i32
  }
  func.func @transform_2(%arg0: i32) -> (i32, i32) {
    %c0_i32 = arith.constant 0 : i32
    %c0_i32_0 = arith.constant 0 : i32
    return %arg0, %c0_i32 : i32, i32
  }
}

module attributes {stable_mosaic.version = 11 : i64} {
  func.func @_fcnet_kernel(%arg0: i32, %arg1: memref<8x128xf32, #tpu.memory_space<vmem>>, %arg2: memref<128x128xf32, #tpu.memory_space<vmem>>, %arg3: memref<1x128xf32, #tpu.memory_space<vmem>>, %arg4: memref<128x128xf32, #tpu.memory_space<vmem>>, %arg5: memref<1x128xf32, #tpu.memory_space<vmem>>, %arg6: memref<128x128xf32, #tpu.memory_space<vmem>>, %arg7: memref<1x128xf32, #tpu.memory_space<vmem>>, %arg8: memref<128x128xf32, #tpu.memory_space<vmem>>, %arg9: memref<1x128xf32, #tpu.memory_space<vmem>>, %arg10: memref<8x128xf32, #tpu.memory_space<vmem>>) attributes {dimension_semantics = [#tpu.dimension_semantics<parallel>], iteration_bounds = array<i64: 1>, scalar_prefetch = 0 : i64, scratch_operands = 0 : i64, tpu.core_type = #tpu.core_type<tc>, window_params = [{transform_indices = @transform_0, window_bounds = array<i64: 8, 128>}, {pipeline_mode = #tpu.pipeline_mode<synchronous>, transform_indices = @transform_1, window_bounds = array<i64: 128, 128>}, {pipeline_mode = #tpu.pipeline_mode<synchronous>, transform_indices = @transform_2, window_bounds = array<i64: 1, 128>}, {pipeline_mode = #tpu.pipeline_mode<synchronous>, transform_indices = @transform_3, window_bounds = array<i64: 128, 128>}, {pipeline_mode = #tpu.pipeline_mode<synchronous>, transform_indices = @transform_4, window_bounds = array<i64: 1, 128>}, {pipeline_mode = #tpu.pipeline_mode<synchronous>, transform_indices = @transform_5, window_bounds = array<i64: 128, 128>}, {pipeline_mode = #tpu.pipeline_mode<synchronous>, transform_indices = @transform_6, window_bounds = array<i64: 1, 128>}, {pipeline_mode = #tpu.pipeline_mode<synchronous>, transform_indices = @transform_7, window_bounds = array<i64: 128, 128>}, {pipeline_mode = #tpu.pipeline_mode<synchronous>, transform_indices = @transform_8, window_bounds = array<i64: 1, 128>}, {transform_indices = @transform_9, window_bounds = array<i64: 8, 128>}]} {
    %c0 = arith.constant 0 : index
    %c0_0 = arith.constant 0 : index
    %0 = vector.load %arg1[%c0, %c0_0] : memref<8x128xf32, #tpu.memory_space<vmem>>, vector<8x128xf32>
    %c0_1 = arith.constant 0 : index
    %c0_2 = arith.constant 0 : index
    %1 = vector.load %arg2[%c0_1, %c0_2] : memref<128x128xf32, #tpu.memory_space<vmem>>, vector<128x128xf32>
    %c0_3 = arith.constant 0 : index
    %c0_4 = arith.constant 0 : index
    %2 = vector.load %arg3[%c0_3, %c0_4] : memref<1x128xf32, #tpu.memory_space<vmem>>, vector<1x128xf32>
    %cst = arith.constant dense<0.000000e+00> : vector<8x128xf32>
    %3 = tpu.matmul %0, %1, %cst {dimension_numbers = #tpu.dot_dimension_numbers<[1], [0], [0], [1], [0, 0, 1, 1], [], []>} : vector<8x128xf32>, vector<128x128xf32>, vector<8x128xf32> -> vector<8x128xf32>
    %4 = vector.broadcast %2 : vector<1x128xf32> to vector<8x128xf32>
    %5 = arith.addf %3, %4 : vector<8x128xf32>
    %cst_5 = arith.constant 0.00999999977 : f32
    %6 = vector.broadcast %cst_5 : f32 to vector<8x128xf32>
    %7 = arith.mulf %6, %5 : vector<8x128xf32>
    %8 = arith.maximumf %5, %7 : vector<8x128xf32>
    %c0_6 = arith.constant 0 : index
    %c0_7 = arith.constant 0 : index
    %9 = vector.load %arg4[%c0_6, %c0_7] : memref<128x128xf32, #tpu.memory_space<vmem>>, vector<128x128xf32>
    %c0_8 = arith.constant 0 : index
    %c0_9 = arith.constant 0 : index
    %10 = vector.load %arg5[%c0_8, %c0_9] : memref<1x128xf32, #tpu.memory_space<vmem>>, vector<1x128xf32>
    %cst_10 = arith.constant dense<0.000000e+00> : vector<8x128xf32>
    %11 = tpu.matmul %8, %9, %cst_10 {dimension_numbers = #tpu.dot_dimension_numbers<[1], [0], [0], [1], [0, 0, 1, 1], [], []>} : vector<8x128xf32>, vector<128x128xf32>, vector<8x128xf32> -> vector<8x128xf32>
    %12 = vector.broadcast %10 : vector<1x128xf32> to vector<8x128xf32>
    %13 = arith.addf %11, %12 : vector<8x128xf32>
    %cst_11 = arith.constant 0.00999999977 : f32
    %14 = vector.broadcast %cst_11 : f32 to vector<8x128xf32>
    %15 = arith.mulf %14, %13 : vector<8x128xf32>
    %16 = arith.maximumf %13, %15 : vector<8x128xf32>
    %c0_12 = arith.constant 0 : index
    %c0_13 = arith.constant 0 : index
    %17 = vector.load %arg6[%c0_12, %c0_13] : memref<128x128xf32, #tpu.memory_space<vmem>>, vector<128x128xf32>
    %c0_14 = arith.constant 0 : index
    %c0_15 = arith.constant 0 : index
    %18 = vector.load %arg7[%c0_14, %c0_15] : memref<1x128xf32, #tpu.memory_space<vmem>>, vector<1x128xf32>
    %cst_16 = arith.constant dense<0.000000e+00> : vector<8x128xf32>
    %19 = tpu.matmul %16, %17, %cst_16 {dimension_numbers = #tpu.dot_dimension_numbers<[1], [0], [0], [1], [0, 0, 1, 1], [], []>} : vector<8x128xf32>, vector<128x128xf32>, vector<8x128xf32> -> vector<8x128xf32>
    %20 = vector.broadcast %18 : vector<1x128xf32> to vector<8x128xf32>
    %21 = arith.addf %19, %20 : vector<8x128xf32>
    %cst_17 = arith.constant 0.00999999977 : f32
    %22 = vector.broadcast %cst_17 : f32 to vector<8x128xf32>
    %23 = arith.mulf %22, %21 : vector<8x128xf32>
    %24 = arith.maximumf %21, %23 : vector<8x128xf32>
    %c0_18 = arith.constant 0 : index
    %c0_19 = arith.constant 0 : index
    %25 = vector.load %arg8[%c0_18, %c0_19] : memref<128x128xf32, #tpu.memory_space<vmem>>, vector<128x128xf32>
    %c0_20 = arith.constant 0 : index
    %c0_21 = arith.constant 0 : index
    %26 = vector.load %arg9[%c0_20, %c0_21] : memref<1x128xf32, #tpu.memory_space<vmem>>, vector<1x128xf32>
    %cst_22 = arith.constant dense<0.000000e+00> : vector<8x128xf32>
    %27 = tpu.matmul %24, %25, %cst_22 {dimension_numbers = #tpu.dot_dimension_numbers<[1], [0], [0], [1], [0, 0, 1, 1], [], []>} : vector<8x128xf32>, vector<128x128xf32>, vector<8x128xf32> -> vector<8x128xf32>
    %28 = vector.broadcast %26 : vector<1x128xf32> to vector<8x128xf32>
    %29 = arith.addf %27, %28 : vector<8x128xf32>
    %c0_23 = arith.constant 0 : index
    %c0_24 = arith.constant 0 : index
    %30 = vector.load %arg10[%c0_23, %c0_24] : memref<8x128xf32, #tpu.memory_space<vmem>>, vector<8x128xf32>
    tpu.vector_store %arg10[%c0_23, %c0_24], %29 {strides = array<i32>} : memref<8x128xf32, #tpu.memory_space<vmem>>, vector<8x128xf32>,
    return
  }
  func.func @transform_0(%arg0: i32) -> (i32, i32) {
    %c0_i32 = arith.constant 0 : i32
    %c0_i32_0 = arith.constant 0 : i32
    return %arg0, %c0_i32 : i32, i32
  }
  func.func @transform_1(%arg0: i32) -> (i32, i32) {
    %c0_i32 = arith.constant 0 : i32
    %c0_i32_0 = arith.constant 0 : i32
    %c0_i32_1 = arith.constant 0 : i32
    return %c0_i32, %c0_i32_0 : i32, i32
  }
  func.func @transform_2(%arg0: i32) -> (i32, i32) {
    %c0_i32 = arith.constant 0 : i32
    %c0_i32_0 = arith.constant 0 : i32
    %c0_i32_1 = arith.constant 0 : i32
    return %c0_i32, %c0_i32_0 : i32, i32
  }
  func.func @transform_3(%arg0: i32) -> (i32, i32) {
    %c0_i32 = arith.constant 0 : i32
    %c0_i32_0 = arith.constant 0 : i32
    %c0_i32_1 = arith.constant 0 : i32
    return %c0_i32, %c0_i32_0 : i32, i32
  }
  func.func @transform_4(%arg0: i32) -> (i32, i32) {
    %c0_i32 = arith.constant 0 : i32
    %c0_i32_0 = arith.constant 0 : i32
    %c0_i32_1 = arith.constant 0 : i32
    return %c0_i32, %c0_i32_0 : i32, i32
  }
  func.func @transform_5(%arg0: i32) -> (i32, i32) {
    %c0_i32 = arith.constant 0 : i32
    %c0_i32_0 = arith.constant 0 : i32
    %c0_i32_1 = arith.constant 0 : i32
    return %c0_i32, %c0_i32_0 : i32, i32
  }
  func.func @transform_6(%arg0: i32) -> (i32, i32) {
    %c0_i32 = arith.constant 0 : i32
    %c0_i32_0 = arith.constant 0 : i32
    %c0_i32_1 = arith.constant 0 : i32
    return %c0_i32, %c0_i32_0 : i32, i32
  }
  func.func @transform_7(%arg0: i32) -> (i32, i32) {
    %c0_i32 = arith.constant 0 : i32
    %c0_i32_0 = arith.constant 0 : i32
    %c0_i32_1 = arith.constant 0 : i32
    return %c0_i32, %c0_i32_0 : i32, i32
  }
  func.func @transform_8(%arg0: i32) -> (i32, i32) {
    %c0_i32 = arith.constant 0 : i32
    %c0_i32_0 = arith.constant 0 : i32
    %c0_i32_1 = arith.constant 0 : i32
    return %c0_i32, %c0_i32_0 : i32, i32
  }
  func.func @transform_9(%arg0: i32) -> (i32, i32) {
    %c0_i32 = arith.constant 0 : i32
    %c0_i32_0 = arith.constant 0 : i32
    return %arg0, %c0_i32 : i32, i32
  }
}

</mosaic_0001>

<bundles_post_ra>
// kernel: tpu_custom_call.1
= control target key start
LH: loop header
LB: loop body
LE: loop exit
PB: predicated region body
PF: predicated region fallthrough
CT: control target
= control target key end

     0   :  { %7 = vsyncpa [#allocation3], 0  ;;  %s690_s0 = inlined_call_operand.hbm [shape: f32[16,128], index: 0, kind: input, shape index: {}]   ;;  %s691_s1 = inlined_call_operand.hbm [shape: f32[8,128], index: 1, kind: input, shape index: {}]   ;;  %s692_s2 = inlined_call_operand.hbm [shape: f32[16,128], index: 2, kind: output, shape index: {}]  }
   0x1   :  { %9 = vsyncpa [#allocation3 + $0x1], 0 }
   0x2   :  { %10 = vsyncpa [#allocation6], 0 }
   0x3   :  { %11 = vsyncpa [#allocation4], 0 }
   0x4   :  { %13 = vsyncpa [#allocation4 + $0x1], 0  ;;  %s489_s9 = smov 0   ;;  %s491_s10 = smov 0  }
   0x5   :  { %s493_s11 = smov 0   ;;  %s495_s12 = smov 0  }
   0x6 LB: > { %s510_s13 = sadd.s32 4294967295, %s469_s12   ;;  %s270_s14 = sadd.s32 4294967294, %s469_s12   ;;  %s469_s12 = sphi %s495_s12, %s716_s12   ;;  %s465_s11 = sphi %s493_s11, %s715_s11   ;;  %s461_s10 = sphi %s491_s10, %s714_s10   ;;  %s457_s9 = sphi %s489_s9, %s713_s9  }
   0x7   : > { %p39_p0 = scmp.ne.s32.totalorder %s461_s10, %s457_s9  ;;  %p693_p1 = scmp.eq.s32.totalorder %s510_s13, 0 }
   0x8   : > { %p90_p3 = scmp.eq.s32.totalorder %s270_s14, 1  ;;  %p271_p5 = scmp.ge.s32.totalorder %s469_s12, 1 }
   0x9   : > { %p519_p4 = por %p693_p1, %p39_p0  ;;  %p97_p7 = scmp.lt.s32.totalorder %s469_s12, 3 }
   0xa   : > { %p524_p6 = por %p90_p3, %p39_p0  ;;  %s471_s18 = smov [#allocation5]  }
   0xb   : > { %s696_s15 = scalar_select %p519_p4, 1, 0 }
   0xc   : > { %s697_s16 = scalar_select %p524_p6, 1, 0 }
   0xd   : > { %p529_p8 = pnand %p271_p5, %p97_p7  ;;  %s110_s19 = sshll.u32 %s471_s18, 4  ;;  %s111_s19 = int_to_ptr.vmem [resolvable:$true] %s110_s19 }
   0xe   : > { %s537_s20 = sadd.s32 1, %s469_s12   ;;  %s26_s24 = sadd.s32 1, %s465_s11 }
   0xf   : > { %s698_s17 = scalar_select %p529_p8, 1, 0 }
  0x10   : > { %p292_p10 = pneg %p529_p8  ;;  %s23_s22 = ssub.s32 %s469_s12, %s537_s20 }
  0x11   : > { %p547_p12 = scmp.eq.s32.totalorder %s23_s22, 0  ;;  %s341_s27 = scalar_lea.hbm %s691_s1, 128 }
  0x12   : > { %p541_p11 = pnand %p292_p10, %p693_p1  ;;  %p342_p0 = scmp.ne.s32.totalorder %s691_s1, %s341_s27 }
  0x13   : > { %s700_s23 = scalar_select %p547_p12, 1, 0 }
  0x14   : > { %p343_p3 = pneg %p541_p11  ;;  %p348_p10 = scmp.lt.u32.totalorder %s341_s27, %s691_s1 }
  0x16   : > { %p344_p5 = pnand %p343_p3, %p342_p0 }
  0x18   : > { %p345_p7 = pneg %p344_p5 }
  0x1a   : > { %p350_p9 = pnand %p348_p10, %p345_p7 }
  0x1c   : > { %353 = shalt.err (!%p350_p9)
}
  0x1d   : > { %s354_s4 = scalar_lea.vmem %s111_s19, 128  ;;  %p362_p6 = scmp.lt.s32.totalorder %s111_s19, %s111_s19 }
  0x1e   : > { %p355_p1 = scmp.ne.s32.totalorder %s111_s19, %s354_s4  ;;  %p363_p4 = scmp.lt.s32.totalorder %s354_s4, %s354_s4 }
  0x20   : > { %p357_p2 = pnand %p355_p1, %p343_p3  ;;  %p364_p8 = por %p363_p4, %p362_p6 }
  0x22   : > { %p358_p13 = pneg %p357_p2 }
  0x24   : > { %p365_p12 = pnand %p364_p8, %p358_p13 }
  0x26   : > { %368 = shalt.err (!%p365_p12)
}
  0x27   : > { %295 = dma.hbm_to_vmem [thread:$0]  (!%p541_p11), %s691_s1, 128, %s111_s19, [#allocation6]  }
  0x28   : > { %p701_p1 = scmp.ne.s32.totalorder %s700_s23, 0  ;;  %p34_p2 = scmp.eq.s32.totalorder %s469_s12, 0 }
  0x29   : > { %p702_p4 = scmp.ne.s32.totalorder %s465_s11, %s461_s10  ;;  %p703_p6 = scmp.eq.s32.totalorder %s510_s13, 1 }
  0x2a   : > { %s573_s7 = scalar_select %p701_p1, %s465_s11, %s26_s24  }
  0x2b   : > { %p581_p8 = por %p703_p6, %p702_p4  ;;  %p305_p9 = scmp.lt.s32.totalorder %s469_s12, 2 }
  0x2c   : > { %s121_s14 = sand.u32 1, %s465_s11   ;;  %p705_p12 = pmov %p702_p4 }
  0x2d   : > { %s274_s18 = sshll.u32 %s121_s14, 3  ;;  %s275_s21 = sshll.u32 %s469_s12, 7 }
  0x2e   : > { %p35_p13 = por %p34_p2, %p705_p12  ;;  %s594_s19 = scalar_lea.hbm %s690_s0, %s275_s21 }
  0x2f   : > { %s125_s23 = scalar_lea.vmem [#allocation2], %s274_s18  ;;  %s122_s27 = scalar_lea.sflag [#allocation3], %s121_s14 }
  0x30   : > { %s132_s24 = sshll.u32 %s125_s23, 4  ;;  %p596_p11 = pnand %p305_p9, %p35_p13  ;;  %s600_s24 = int_to_ptr.vmem [resolvable:$true] %s132_s24 }
  0x31   : > { %s369_s28 = scalar_lea.hbm %s594_s19, 128  ;;  %s374_s3 = scalar_lea.hbm %s690_s0, 256 }
  0x32   : > { %p370_p0 = scmp.ne.s32.totalorder %s594_s19, %s369_s28  ;;  %p371_p3 = pneg %p596_p11 }
  0x33   : > { %p375_p10 = scmp.lt.u32.totalorder %s594_s19, %s690_s0  ;;  %p376_p1 = scmp.lt.u32.totalorder %s374_s3, %s369_s28 }
  0x34   : > { %p372_p5 = pnand %p371_p3, %p370_p0  ;;  %p378_p4 = scmp.lt.u32.totalorder %s369_s28, %s594_s19 }
  0x35   : > { %p377_p2 = por %p376_p1, %p375_p10 }
  0x36   : > { %p373_p7 = pneg %p372_p5 }
  0x37   : > { %p379_p6 = por %p378_p4, %p377_p2 }
  0x39   : > { %p380_p9 = pnand %p379_p6, %p373_p7 }
  0x3b   : > { %383 = shalt.err (!%p380_p9)
}
  0x3c   : > { %s384_s6 = scalar_lea.vmem %s600_s24, 128  ;;  %s472_s14 = smov [#allocation2]  }
  0x3d   : > { %p385_p12 = scmp.ne.s32.totalorder %s600_s24, %s384_s6  ;;  %s389_s18 = sshll.u32 %s472_s14, 4  ;;  %s390_s18 = int_to_ptr.vmem [resolvable:$false] %s389_s18 }
  0x3e   : > { %s391_s21 = scalar_lea.vmem %s390_s18, 256  ;;  %p392_p5 = scmp.lt.s32.totalorder %s600_s24, %s390_s18 }
  0x3f   : > { %p387_p13 = pnand %p385_p12, %p371_p3  ;;  %p393_p10 = scmp.lt.s32.totalorder %s391_s21, %s384_s6 }
  0x41   : > { %p388_p0 = pneg %p387_p13  ;;  %p394_p1 = por %p393_p10, %p392_p5 }
  0x43   : > { %p395_p2 = pnand %p394_p1, %p388_p0 }
  0x45   : > { %398 = shalt.err (!%p395_p2)
}
  0x46   : > { %299 = dma.hbm_to_vmem [thread:$0]  (!%p596_p11), %s594_s19, 128, %s600_s24, %s122_s27  }
  0x47   : > { %p707_p7 = scmp.ne.s32.totalorder %s698_s17, 0 }
  0x48   : > { %s630_s22 = sand.u32 (!%p707_p7), 1, %s461_s10   ;;  %p708_p3 = scmp.ne.s32.totalorder (!%p707_p7), %s696_s15, 0 }
  0x49   : > { %141 = sbr.rel (%p707_p7) target bundleno = 109 (0x6d), region = 28  ;;  %s277_s25 = sshll.u32 (!%p707_p7), %s630_s22, 3 }
  0x4a   : > { %s144_s23 = scalar_lea.sflag (!%p707_p7), [#allocation3], %s630_s22  ;;  %s147_s28 = scalar_lea.vmem (!%p707_p7), [#allocation2], %s277_s25 }
  0x50   : > { %444 = dma.done.wait (%p708_p3), %s144_s23, 128  }
  0x51   : > { %446 = vsyncadd (%p708_p3), %s144_s23, 4294967168  ;;  %p709_p4 = scmp.eq.s32.totalorder %s510_s13, 0 }
  0x53   : > { %448 = dma.done.wait (%p709_p4), [#allocation6], 128   ;;  %p710_p11 = pmov %p709_p4 }
  0x54   : > { %s171_s17 = scalar_lea.vmem [#allocation7], %s277_s25  ;;  %s281_s24 = sshll.u32 %s510_s13, 7  ;;  %v172_v0 = vld [vmem:[%s147_s28] sm:$0xff]  ;;  %v173_v1 = vld [vmem:[#allocation5] sm:$0xff] }
  0x55   : > { %450 = vsyncadd (%p710_p11), [#allocation6], 4294967168  ;;  %s190_s19 = sshll.u32 %s171_s17, 4  ;;  %v174_v2 = vadd.f32 %v173_v1, %v172_v0  ;;  %s648_s27 = scalar_lea.hbm %s692_s2, %s281_s24  ;;  %s643_s19 = int_to_ptr.vmem [resolvable:$true] %s190_s19 }
  0x56   : > { %s177_s29 = scalar_lea.sflag [#allocation4], %s630_s22  ;;  %s399_s30 = scalar_lea.vmem %s643_s19, 128 }
  0x57   : > { %175 = vst [vmem:[%s171_s17] sm:$0xff] %v174_v2  ;;  %p400_p6 = scmp.ne.s32.totalorder %s643_s19, %s399_s30  ;;  %s473_s13 = smov [#allocation7]  }
  0x58   : > { %s403_s3 = sshll.u32 %s473_s13, 4  ;;  %s404_s3 = int_to_ptr.vmem [resolvable:$false] %s403_s3 }
  0x59   : > { %p401_p9 = pnand %p400_p6, %p581_p8  ;;  %s405_s4 = scalar_lea.vmem %s404_s3, 256 }
  0x5a   : > { %p406_p13 = scmp.lt.s32.totalorder %s643_s19, %s404_s3  ;;  %p407_p0 = scmp.lt.s32.totalorder %s405_s4, %s399_s30 }
  0x5b   : > { %p402_p12 = pneg %p401_p9 }
  0x5c   : > { %p408_p5 = por %p407_p0, %p406_p13 }
  0x5e   : > { %p409_p10 = pnand %p408_p5, %p402_p12 }
  0x60   : > { %412 = shalt.err (!%p409_p10)
}
  0x61   : > { %s413_s5 = scalar_lea.hbm %s648_s27, 128  ;;  %s417_s18 = scalar_lea.hbm %s692_s2, 256 }
  0x62   : > { %p414_p1 = scmp.ne.s32.totalorder %s648_s27, %s413_s5  ;;  %p418_p3 = scmp.lt.u32.totalorder %s648_s27, %s692_s2 }
  0x63   : > { %p419_p4 = scmp.lt.u32.totalorder %s417_s18, %s413_s5  ;;  %p421_p6 = scmp.lt.u32.totalorder %s413_s5, %s648_s27 }
  0x64   : > { %p415_p2 = pnand %p414_p1, %p581_p8 }
  0x65   : > { %p420_p11 = por %p419_p4, %p418_p3 }
  0x66   : > { %p416_p7 = pneg %p415_p2 }
  0x67   : > { %p422_p9 = por %p421_p6, %p420_p11 }
  0x69   : > { %p423_p12 = pnand %p422_p9, %p416_p7 }
  0x6b   : > { %426 = shalt.err (!%p423_p12)
}
  0x6c   : > { %290 = dma.vmem_to_hbm [thread:$0]  (%p581_p8), %s643_s19, 128, %s648_s27, %s177_s29  }
  0x6d PF: > { %s202_s25 = sand.u32 1, %s457_s9   ;;  %p711_p13 = scmp.ne.s32.totalorder %s697_s16, 0 }
  0x6e   : > { %p712_p0 = scmp.ge.s32.totalorder %s469_s12, 2  ;;  %s203_s23 = scalar_lea.sflag [#allocation4], %s202_s25 }
  0x70   : > { %p301_p5 = pnand %p712_p0, %p711_p13 }
  0x72   : > { %452 = dma.done.wait (!%p301_p5), %s203_s23, 128  }
  0x73   : > { %454 = vsyncadd (!%p301_p5), %s203_s23, 4294967168  ;;  %p16_p10 = scmp.ge.s32.totalorder %s537_s20, 4   ;;  %s713_s9 = smov %s461_s10 }
  0x74   : > { %s714_s10 = smov %s465_s11  ;;  %s715_s11 = smov %s573_s7 }
  0x75   : > { %s716_s12 = smov %s537_s20  ;;  %18 = sbr.rel (!%p16_p10) target bundleno = 6 (0x6), region = 77 }
  0x7c   :  { %208 = vsyncpa [#allocation3], 1 }
  0x7d   :  { %210 = vsyncpa [#allocation3 + $0x1], 1 }
  0x7e   :  { %211 = vsyncpa [#allocation6], 1 }
  0x7f   :  { %212 = vsyncpa [#allocation4], 1 }
  0x80   :  { %214 = vsyncpa [#allocation4 + $0x1], 1 }

// kernel: fcnet_forward.1
= control target key start
LH: loop header
LB: loop body
LE: loop exit
PB: predicated region body
PF: predicated region fallthrough
CT: control target
= control target key end

     0   :  { %14 = vsyncpa [#allocation3], 0  ;;  %s1076_s0 = inlined_call_operand.vmem [shape: f32[8,128], index: 0, kind: input, shape index: {}]   ;;  %s1077_s1 = inlined_call_operand.hbm [shape: f32[128,128], index: 1, kind: input, shape index: {}]   ;;  %s1078_s2 = inlined_call_operand.vmem [shape: f32[1,128], index: 2, kind: input, shape index: {}]   ;;  %s1079_s3 = inlined_call_operand.hbm [shape: f32[128,128], index: 3, kind: input, shape index: {}]   ;;  %s1080_s4 = inlined_call_operand.vmem [shape: f32[1,128], index: 4, kind: input, shape index: {}]   ;;  %s1081_s5 = inlined_call_operand.hbm [shape: f32[128,128], index: 5, kind: input, shape index: {}]   ;;  %s1082_s6 = inlined_call_operand.vmem [shape: f32[1,128], index: 6, kind: input, shape index: {}]   ;;  %s1083_s7 = inlined_call_operand.hbm [shape: f32[128,128], index: 7, kind: input, shape index: {}]   ;;  %s1084_s8 = inlined_call_operand.vmem [shape: f32[1,128], index: 8, kind: input, shape index: {}]   ;;  %s1085_s9 = inlined_call_operand.vmem [shape: f32[8,128], index: 9, kind: output, shape index: {}]  }
   0x1   :  { %15 = vsyncpa [#allocation5], 0 }
   0x2   :  { %16 = vsyncpa [#allocation8], 0  ;;  %s885_s30 = smov [#allocation4]   ;;  %s886_s11 = smov [#allocation2]  }
   0x3   :  { %s38_s10 = sshll.u32 %s885_s30, 4  ;;  %s24_s12 = sshll.u32 %s886_s11, 4  ;;  %s39_s10 = int_to_ptr.vmem [resolvable:$true] %s38_s10  ;;  %s944_s12 = int_to_ptr.vmem [resolvable:$true] %s24_s12 }
   0x4   :  { %s791_s15 = scalar_lea.hbm %s1079_s3, 2048 }
   0x5   :  { %p792_p0 = scmp.ne.s32.totalorder %s1079_s3, %s791_s15  ;;  %p795_p1 = scmp.lt.u32.totalorder %s791_s15, %s1079_s3 }
   0x7   :  { %p797_p2 = pnand %p795_p1, %p792_p0 }
   0x9   :  { %800 = shalt.err (!%p797_p2)
}
   0xa   :  { %s801_s20 = scalar_lea.vmem %s39_s10, 2048  ;;  %p806_p4 = scmp.lt.s32.totalorder %s39_s10, %s39_s10 }
   0xb   :  { %p802_p3 = scmp.ne.s32.totalorder %s39_s10, %s801_s20  ;;  %p807_p5 = scmp.lt.s32.totalorder %s801_s20, %s801_s20 }
   0xd   :  { %p808_p6 = por %p807_p5, %p806_p4 }
   0xf   :  { %p809_p7 = pnand %p808_p6, %p802_p3 }
  0x11   :  { %812 = shalt.err (!%p809_p7)
}
  0x12   :  { %s887_s21 = smov 128   ;;  %s888_s22 = smov 8  }
  0x13   :  { %44 = dma.hbm_to_vmem [thread:$0]  %s1079_s3, 2048, %s39_s10, [#allocation5], %s887_s21, %s887_s21, %s888_s22  }
  0x14   :  { %s813_s27 = scalar_lea.hbm %s1077_s1, 2048 }
  0x15   :  { %p814_p8 = scmp.ne.s32.totalorder %s1077_s1, %s813_s27  ;;  %p817_p9 = scmp.lt.u32.totalorder %s813_s27, %s1077_s1 }
  0x17   :  { %p819_p10 = pnand %p817_p9, %p814_p8 }
  0x19   :  { %822 = shalt.err (!%p819_p10)
}
  0x1a   :  { %s823_s13 = scalar_lea.vmem %s944_s12, 2048  ;;  %p828_p12 = scmp.lt.s32.totalorder %s944_s12, %s944_s12 }
  0x1b   :  { %p824_p11 = scmp.ne.s32.totalorder %s944_s12, %s823_s13  ;;  %p829_p13 = scmp.lt.s32.totalorder %s823_s13, %s823_s13 }
  0x1d   :  { %p830_p0 = por %p829_p13, %p828_p12 }
  0x1f   :  { %p831_p1 = pnand %p830_p0, %p824_p11 }
  0x21   :  { %834 = shalt.err (!%p831_p1)
}
  0x22   :  { %30 = dma.hbm_to_vmem [thread:$0]  %s1077_s1, 2048, %s944_s12, [#allocation3], %s887_s21, %s887_s21, %s888_s22  }
  0x23   :  { %s889_s14 = smov [#allocation6]   ;;  %s890_s16 = smov [#allocation7]  }
  0x24   :  { %s52_s15 = sshll.u32 %s889_s14, 4  ;;  %s66_s17 = sshll.u32 %s890_s16, 4  ;;  %s53_s15 = int_to_ptr.vmem [resolvable:$true] %s52_s15  ;;  %s981_s17 = int_to_ptr.vmem [resolvable:$true] %s66_s17 }
  0x25   :  { %s835_s20 = scalar_lea.hbm %s1081_s5, 2048 }
  0x26   :  { %p836_p2 = scmp.ne.s32.totalorder %s1081_s5, %s835_s20  ;;  %p839_p3 = scmp.lt.u32.totalorder %s835_s20, %s1081_s5 }
  0x28   :  { %p841_p4 = pnand %p839_p3, %p836_p2 }
  0x2a   :  { %844 = shalt.err (!%p841_p4)
}
  0x2b   :  { %s845_s1 = scalar_lea.vmem %s53_s15, 2048  ;;  %p850_p6 = scmp.lt.s32.totalorder %s53_s15, %s53_s15 }
  0x2c   :  { %p846_p5 = scmp.ne.s32.totalorder %s53_s15, %s845_s1  ;;  %p851_p7 = scmp.lt.s32.totalorder %s845_s1, %s845_s1 }
  0x2e   :  { %p852_p8 = por %p851_p7, %p850_p6 }
  0x30   :  { %p853_p9 = pnand %p852_p8, %p846_p5 }
  0x32   :  { %856 = shalt.err (!%p853_p9)
}
  0x33   :  { %58 = dma.hbm_to_vmem [thread:$0]  %s1081_s5, 2048, %s53_s15, [#allocation5], %s887_s21, %s887_s21, %s888_s22  }
  0x34   :  { %s857_s30 = scalar_lea.hbm %s1083_s7, 2048 }
  0x35   :  { %p858_p10 = scmp.ne.s32.totalorder %s1083_s7, %s857_s30  ;;  %p861_p11 = scmp.lt.u32.totalorder %s857_s30, %s1083_s7 }
  0x37   :  { %p863_p12 = pnand %p861_p11, %p858_p10 }
  0x39   :  { %866 = shalt.err (!%p863_p12)
}
  0x3a   :  { %s867_s14 = scalar_lea.vmem %s981_s17, 2048  ;;  %p872_p0 = scmp.lt.s32.totalorder %s981_s17, %s981_s17 }
  0x3b   :  { %p868_p13 = scmp.ne.s32.totalorder %s981_s17, %s867_s14  ;;  %p873_p1 = scmp.lt.s32.totalorder %s867_s14, %s867_s14 }
  0x3d   :  { %p874_p2 = por %p873_p1, %p872_p0 }
  0x3f   :  { %p875_p3 = pnand %p874_p2, %p868_p13 }
  0x41   :  { %878 = shalt.err (!%p875_p3)
}
  0x42   :  { %72 = dma.hbm_to_vmem [thread:$0]  %s1083_s7, 2048, %s981_s17, [#allocation8], %s887_s21, %s887_s21, %s888_s22  }
  0x43   :  { %879 = dma.done.wait [#allocation3], 2048  }
  0x44   :  { %880 = vsyncadd [#allocation3], 4294965248 }
  0x45   :  { %881 = dma.done.wait [#allocation5], 4096  }
  0x46   :  { %882 = vsyncadd [#allocation5], 4294963200 }
  0x47   :  { %883 = dma.done.wait [#allocation8], 2048  }
  0x48   :  { %884 = vsyncadd [#allocation8], 4294965248  ;;  %v891_v0 = vmov 0.0|0.0   ;;  %vm892_vm0 = vmmov 0   ;;  %v893_v1 = vmov 0.0   ;;  %v88_v2 = vld [vmem:[#allocation2] sm:$0xff] }
  0x49   :  { %686 = vmatprep.subr.bf16.mxu0 %v891_v0  ;;  %578 = vmatprep.mubr.msk.f32.mxu0 %vm892_vm0, %v893_v1  ;;  %v89_v3 = vld [vmem:[#allocation2 + $0x8] sm:$0xff]  ;;  %v90_v4 = vld [vmem:[#allocation2 + $0x10] sm:$0xff]  ;;  %v91_v6 = vld [vmem:[#allocation2 + $0x18] sm:$0xff] }
  0x4a   :  { %710 = vmatprep.subr.bf16.mxu1 %v891_v0  ;;  %613 = vmatprep.mubr.msk.f32.mxu1 %vm892_vm0, %v893_v1  ;;  %v687_v5 = vpack.c.bf16 %v89_v3, %v88_v2  ;;  %v690_v7 = vpack.c.bf16 %v91_v6, %v90_v4  ;;  %v92_v8 = vld [vmem:[#allocation2 + $0x20] sm:$0xff]  ;;  %v93_v9 = vld [vmem:[#allocation2 + $0x28] sm:$0xff]  ;;  %v185_v12 = vld [vmem:[#allocation4 + $0x10] sm:$0xff] }
  0x4b   :  { %v183_v10 = vld [vmem:[#allocation4] sm:$0xff]  ;;  %v184_v11 = vld [vmem:[#allocation4 + $0x8] sm:$0xff]  ;;  %v186_v13 = vld [vmem:[#allocation4 + $0x18] sm:$0xff]  ;;  %v693_v14 = vpack.c.bf16 %v93_v9, %v92_v8 }
  0x4c   :  { %688 = vmatpush3.bf16.msra.mxu0 %v687_v5  ;;  %v711_v15 = vpack.c.bf16 %v184_v11, %v183_v10  ;;  %v94_v16 = vld [vmem:[#allocation2 + $0x30] sm:$0xff]  ;;  %v95_v17 = vld [vmem:[#allocation2 + $0x38] sm:$0xff]  ;;  %v714_v18 = vpack.c.bf16 %v186_v13, %v185_v12  ;;  %v187_v19 = vld [vmem:[#allocation4 + $0x20] sm:$0xff] }
  0x4d   :  { %689 = vmatprep.subr.bf16.mxu0 %v891_v0  ;;  %v188_v20 = vld [vmem:[#allocation4 + $0x28] sm:$0xff]  ;;  %v696_v21 = vpack.c.bf16 %v95_v17, %v94_v16  ;;  %v96_v22 = vld [vmem:[#allocation2 + $0x40] sm:$0xff]  ;;  %v189_v25 = vld [vmem:[#allocation4 + $0x30] sm:$0xff] }
  0x4e   :  { %712 = vmatpush3.bf16.msra.mxu1 %v711_v15  ;;  %v97_v23 = vld [vmem:[#allocation2 + $0x48] sm:$0xff]  ;;  %v717_v24 = vpack.c.bf16 %v188_v20, %v187_v19  ;;  %v190_v26 = vld [vmem:[#allocation4 + $0x38] sm:$0xff]  ;;  %v98_v28 = vld [vmem:[#allocation2 + $0x50] sm:$0xff] }
  0x4f   :  { %713 = vmatprep.subr.bf16.mxu1 %v891_v0  ;;  %v699_v27 = vpack.c.bf16 %v97_v23, %v96_v22  ;;  %v99_v29 = vld [vmem:[#allocation2 + $0x58] sm:$0xff]  ;;  %v720_v30 = vpack.c.bf16 %v190_v26, %v189_v25  ;;  %v191_v31 = vld [vmem:[#allocation4 + $0x40] sm:$0xff]  ;;  %v192_v32 = vld [vmem:[#allocation4 + $0x48] sm:$0xff] }
  0x50   :  { %691 = vmatpush3.bf16.msra.mxu0 %v690_v7  ;;  %v702_v33 = vpack.c.bf16 %v99_v29, %v98_v28  ;;  %v100_v34 = vld [vmem:[#allocation2 + $0x60] sm:$0xff]  ;;  %v101_v35 = vld [vmem:[#allocation2 + $0x68] sm:$0xff]  ;;  %v723_v36 = vpack.c.bf16 %v192_v32, %v191_v31  ;;  %v193_v37 = vld [vmem:[#allocation4 + $0x50] sm:$0xff] }
  0x51   :  { %692 = vmatprep.subr.bf16.mxu0 %v891_v0  ;;  %v194_v38 = vld [vmem:[#allocation4 + $0x58] sm:$0xff]  ;;  %v705_v39 = vpack.c.bf16 %v101_v35, %v100_v34  ;;  %v102_v40 = vld [vmem:[#allocation2 + $0x70] sm:$0xff]  ;;  %v87_v44 = vld [vmem:[%s1076_s0] sm:$0xff] }
  0x52   :  { %715 = vmatpush3.bf16.msra.mxu1 %v714_v18  ;;  %v103_v41 = vld [vmem:[#allocation2 + $0x78] sm:$0xff]  ;;  %v726_v42 = vpack.c.bf16 %v194_v38, %v193_v37  ;;  %v195_v45 = vld [vmem:[#allocation4 + $0x60] sm:$0xff]  ;;  %v196_v46 = vld [vmem:[#allocation4 + $0x68] sm:$0xff] }
  0x53   :  { %716 = vmatprep.subr.bf16.mxu1 %v891_v0  ;;  %v708_v43 = vpack.c.bf16 %v103_v41, %v102_v40  ;;  %v729_v47 = vpack.c.bf16 %v196_v46, %v195_v45  ;;  %v197_v48 = vld [vmem:[#allocation4 + $0x70] sm:$0xff]  ;;  %v198_v49 = vld [vmem:[#allocation4 + $0x78] sm:$0xff]  ;;  %v278_v51 = vld [vmem:[#allocation6] sm:$0xff] }
  0x54   :  { %694 = vmatpush3.bf16.msra.mxu0 %v693_v14  ;;  %v732_v50 = vpack.c.bf16 %v198_v49, %v197_v48  ;;  %v279_v52 = vld [vmem:[#allocation6 + $0x8] sm:$0xff]  ;;  %v280_v53 = vld [vmem:[#allocation6 + $0x10] sm:$0xff]  ;;  %v281_v55 = vld [vmem:[#allocation6 + $0x18] sm:$0xff] }
  0x55   :  { %695 = vmatprep.subr.bf16.mxu0 %v891_v0  ;;  %v735_v54 = vpack.c.bf16 %v279_v52, %v278_v51  ;;  %v738_v56 = vpack.c.bf16 %v281_v55, %v280_v53  ;;  %v282_v57 = vld [vmem:[#allocation6 + $0x20] sm:$0xff]  ;;  %v283_v58 = vld [vmem:[#allocation6 + $0x28] sm:$0xff]  ;;  %v284_v60 = vld [vmem:[#allocation6 + $0x30] sm:$0xff] }
  0x56   :  { %718 = vmatpush3.bf16.msra.mxu1 %v717_v24  ;;  %v741_v59 = vpack.c.bf16 %v283_v58, %v282_v57  ;;  %v285_v61 = vld [vmem:[#allocation6 + $0x38] sm:$0xff]  ;;  %v286_v63 = vld [vmem:[#allocation6 + $0x40] sm:$0xff]  ;;  %v287_v2 = vld [vmem:[#allocation6 + $0x48] sm:$0xff] }
  0x57   :  { %719 = vmatprep.subr.bf16.mxu1 %v891_v0  ;;  %v744_v62 = vpack.c.bf16 %v285_v61, %v284_v60  ;;  %v747_v3 = vpack.c.bf16 %v287_v2, %v286_v63  ;;  %v288_v4 = vld [vmem:[#allocation6 + $0x50] sm:$0xff]  ;;  %v289_v5 = vld [vmem:[#allocation6 + $0x58] sm:$0xff]  ;;  %v474_v7 = vld [vmem:[%s1078_s2] ss:$0 sm:$0xff] }
  0x58   :  { %697 = vmatpush3.bf16.msra.mxu0 %v696_v21  ;;  %v750_v6 = vpack.c.bf16 %v289_v5, %v288_v4  ;;  %v290_v13 = vld [vmem:[#allocation6 + $0x60] sm:$0xff]  ;;  %v291_v14 = vld [vmem:[#allocation6 + $0x68] sm:$0xff]  ;;  %v292_v16 = vld [vmem:[#allocation6 + $0x70] sm:$0xff] }
  0x59   :  { %698 = vmatprep.subr.bf16.mxu0 %v891_v0  ;;  %v753_v15 = vpack.c.bf16 %v291_v14, %v290_v13  ;;  %v293_v17 = vld [vmem:[#allocation6 + $0x78] sm:$0xff]  ;;  %v373_v19 = vld [vmem:[#allocation7] sm:$0xff]  ;;  %v374_v20 = vld [vmem:[#allocation7 + $0x8] sm:$0xff] }
  0x5a   :  { %721 = vmatpush3.bf16.msra.mxu1 %v720_v30  ;;  %v756_v18 = vpack.c.bf16 %v293_v17, %v292_v16  ;;  %v375_v21 = vld [vmem:[#allocation7 + $0x10] sm:$0xff]  ;;  %v759_v22 = vpack.c.bf16 %v374_v20, %v373_v19  ;;  %v376_v23 = vld [vmem:[#allocation7 + $0x18] sm:$0xff]  ;;  %v378_v25 = vld [vmem:[#allocation7 + $0x28] sm:$0xff] }
  0x5b   :  { %722 = vmatprep.subr.bf16.mxu1 %v891_v0  ;;  %v762_v24 = vpack.c.bf16 %v376_v23, %v375_v21  ;;  %v380_v28 = vld [vmem:[#allocation7 + $0x38] sm:$0xff]  ;;  %v381_v30 = vld [vmem:[#allocation7 + $0x40] sm:$0xff]  ;;  %v382_v31 = vld [vmem:[#allocation7 + $0x48] sm:$0xff] }
  0x5c   :  { %700 = vmatpush3.bf16.msra.mxu0 %v699_v27  ;;  %v379_v27 = vld [vmem:[#allocation7 + $0x30] sm:$0xff]  ;;  %v771_v32 = vpack.c.bf16 %v382_v31, %v381_v30  ;;  %v384_v34 = vld [vmem:[#allocation7 + $0x58] sm:$0xff]  ;;  %v476_v48 = vld [vmem:[%s1082_s6] ss:$0 sm:$0xff] }
  0x5d   :  { %701 = vmatprep.subr.bf16.mxu0 %v891_v0  ;;  %v768_v29 = vpack.c.bf16 %v380_v28, %v379_v27  ;;  %v387_v45 = vld [vmem:[#allocation7 + $0x70] sm:$0xff]  ;;  %v388_v46 = vld [vmem:[#allocation7 + $0x78] sm:$0xff] }
  0x5e   :  { %724 = vmatpush3.bf16.msra.mxu1 %v723_v36  ;;  %v475_v36 = vld [vmem:[%s1080_s4] ss:$0 sm:$0xff] }
  0x5f   :  { %725 = vmatprep.subr.bf16.mxu1 %v891_v0 }
  0x60   :  { %703 = vmatpush3.bf16.msra.mxu0 %v702_v33  ;;  %v383_v33 = vld [vmem:[#allocation7 + $0x50] sm:$0xff] }
  0x61   :  { %704 = vmatprep.subr.bf16.mxu0 %v891_v0  ;;  %v774_v35 = vpack.c.bf16 %v384_v34, %v383_v33 }
  0x62   :  { %727 = vmatpush3.bf16.msra.mxu1 %v726_v42  ;;  %v385_v42 = vld [vmem:[#allocation7 + $0x60] sm:$0xff] }
  0x63   :  { %728 = vmatprep.subr.bf16.mxu1 %v891_v0 }
  0x64   :  { %706 = vmatpush3.bf16.msra.mxu0 %v705_v39 }
  0x65   :  { %707 = vmatprep.subr.bf16.mxu0 %v891_v0 }
  0x66   :  { %730 = vmatpush3.bf16.msra.mxu1 %v729_v47  ;;  %v780_v47 = vpack.c.bf16 %v388_v46, %v387_v45 }
  0x67   :  { %731 = vmatprep.subr.bf16.mxu1 %v891_v0 }
  0x68   :  { %709 = vmatpush3.bf16.msra.mxu0 %v708_v43  ;;  %v386_v43 = vld [vmem:[#allocation7 + $0x68] sm:$0xff] }
  0x69   :  { %734 = vmatprep.subr.bf16.mxu0 %v891_v0 }
  0x6a   :  { %733 = vmatpush3.bf16.msra.mxu1 %v732_v50 }
  0x6b   :  { %579 = vmatmul.mubr.f32.vlgmr.msra.gmra.mrb[0].mxu0 %v87_v44  ;;  %758 = vmatprep.subr.bf16.mxu1 %v891_v0  ;;  %v777_v44 = vpack.c.bf16 %v386_v43, %v385_v42 }
  0x6c   :  { %648 = vmatprep.mubr.msk.f32.mxu0 %vm892_vm0, %v893_v1  ;;  %736 = vmatpush3.bf16.msra.mxu0 %v735_v54  ;;  %v477_v54 = vld [vmem:[%s1084_s8] ss:$0 sm:$0xff] }
  0x6d   :  { %737 = vmatprep.subr.bf16.mxu0 %v891_v0 }
  0x70   :  { %739 = vmatpush3.bf16.msra.mxu0 %v738_v56 }
  0x71   :  { %740 = vmatprep.subr.bf16.mxu0 %v891_v0 }
  0x74   :  { %742 = vmatpush3.bf16.msra.mxu0 %v741_v59 }
  0x75   :  { %743 = vmatprep.subr.bf16.mxu0 %v891_v0 }
  0x78   :  { %745 = vmatpush3.bf16.msra.mxu0 %v744_v62 }
  0x79   :  { %746 = vmatprep.subr.bf16.mxu0 %v891_v0 }
  0x7c   :  { %748 = vmatpush3.bf16.msra.mxu0 %v747_v3 }
  0x7d   :  { %749 = vmatprep.subr.bf16.mxu0 %v891_v0 }
  0x80   :  { %751 = vmatpush3.bf16.msra.mxu0 %v750_v6 }
  0x81   :  { %752 = vmatprep.subr.bf16.mxu0 %v891_v0 }
  0x84   :  { %754 = vmatpush3.bf16.msra.mxu0 %v753_v15 }
  0x85   :  { %755 = vmatprep.subr.bf16.mxu0 %v891_v0 }
  0x88   :  { %757 = vmatpush3.bf16.msra.mxu0 %v756_v18 }
 0x13e   :  { %v177_v8 = vpop.f32.mrb[0].mxu0 }
 0x13f   :  { %v178_v9 = vadd.f32 %v474_v7, %v177_v8  ;;  %v580_v10 = vpop.f32.mrb[1].mxu0 }
 0x141   :  { %v181_v11 = vmul.f32 0.01, %v178_v9 }
 0x143   :  { %v182_v12 = vmax.f32 %v178_v9, %v181_v11 }
 0x145   :  { %614 = vmatmul.mubr.f32.vlgmr.msra.gmra.mrb[0].mxu1 %v182_v12 }
 0x146   :  { %683 = vmatprep.mubr.msk.f32.mxu1 %vm892_vm0, %v893_v1  ;;  %760 = vmatpush3.bf16.msra.mxu1 %v759_v22  ;;  %v377_v1 = vld [vmem:[#allocation7 + $0x20] sm:$0xff] }
 0x147   :  { %761 = vmatprep.subr.bf16.mxu1 %v891_v0  ;;  %v765_v26 = vpack.c.bf16 %v378_v25, %v377_v1 }
 0x14a   :  { %763 = vmatpush3.bf16.msra.mxu1 %v762_v24 }
 0x14b   :  { %764 = vmatprep.subr.bf16.mxu1 %v891_v0 }
 0x14e   :  { %766 = vmatpush3.bf16.msra.mxu1 %v765_v26 }
 0x14f   :  { %767 = vmatprep.subr.bf16.mxu1 %v891_v0 }
 0x152   :  { %769 = vmatpush3.bf16.msra.mxu1 %v768_v29 }
 0x153   :  { %770 = vmatprep.subr.bf16.mxu1 %v891_v0 }
 0x156   :  { %772 = vmatpush3.bf16.msra.mxu1 %v771_v32 }
 0x157   :  { %773 = vmatprep.subr.bf16.mxu1 %v891_v0 }
 0x15a   :  { %775 = vmatpush3.bf16.msra.mxu1 %v774_v35 }
 0x15b   :  { %776 = vmatprep.subr.bf16.mxu1 %v891_v0 }
 0x15e   :  { %778 = vmatpush3.bf16.msra.mxu1 %v777_v44 }
 0x15f   :  { %779 = vmatprep.subr.bf16.mxu1 %v891_v0 }
 0x162   :  { %781 = vmatpush3.bf16.msra.mxu1 %v780_v47 }
 0x218   :  { %v272_v37 = vpop.f32.mrb[0].mxu1 }
 0x219   :  { %v273_v38 = vadd.f32 %v475_v36, %v272_v37  ;;  %v615_v39 = vpop.f32.mrb[1].mxu1 }
 0x21b   :  { %v276_v40 = vmul.f32 0.01, %v273_v38 }
 0x21d   :  { %v277_v41 = vmax.f32 %v273_v38, %v276_v40 }
 0x21f   :  { %649 = vmatmul.mubr.f32.vlgmr.msra.gmra.mrb[2].mxu0 %v277_v41 }
 0x2f2   :  { %v367_v49 = vpop.f32.mrb[2].mxu0 }
 0x2f3   :  { %v368_v50 = vadd.f32 %v476_v48, %v367_v49  ;;  %v650_v51 = vpop.f32.mrb[3].mxu0 }
 0x2f5   :  { %v371_v52 = vmul.f32 0.01, %v368_v50 }
 0x2f7   :  { %v372_v53 = vmax.f32 %v368_v50, %v371_v52 }
 0x2f9   :  { %684 = vmatmul.mubr.f32.vlgmr.msra.gmra.mrb[2].mxu1 %v372_v53 }
 0x3cc   :  { %v462_v55 = vpop.f32.mrb[2].mxu1 }
 0x3cd   :  { %v463_v0 = vadd.f32 %v477_v54, %v462_v55  ;;  %v685_v56 = vpop.f32.mrb[3].mxu1 }
 0x3cf   :  { %466 = vst [vmem:[%s1085_s9] sm:$0xff] %v463_v0 }
 0x3d0   :  { %471 = vsyncpa [#allocation3], 1 }
 0x3d1   :  { %472 = vsyncpa [#allocation5], 1 }
 0x3d2   :  { %473 = vsyncpa [#allocation8], 1 }

</bundles_post_ra>
